<compile_context>
chip_gen: v7x
topology: tpu7x:2x2x1
jax: 0.10.0
libtpu: 0.0.40
codegen_flags: <defaults>
</compile_context>

<pallas_src>
import jax
import jax.numpy as jnp
from jax.experimental import pallas as pl
from jax.experimental.pallas import tpu as pltpu

BOARD_SIZE = 9
HIDDEN = 18

# Packed-parameter slab layout (all row offsets are multiples of 8; all column offsets 0):
#   rows  0..17  : W1 (18x9)  in cols [0:9]
#   rows 24..41  : W2 (18x18) in cols [0:18]
#   rows 48..56  : W3 (9x18)  in cols [0:18]
#   rows 64..81  : b1 (18,)   in col 0
#   rows 88..105 : b2 (18,)   in col 0
#   rows 112..120: b3 (9,)    in col 0
W1_ROW, W2_ROW, W3_ROW = 0, 24, 48
B1_ROW, B2_ROW, B3_ROW = 64, 88, 112
PARAM_ROWS, PARAM_COLS = 128, 32

TARGET_GRID_STEPS = 8     # >=2 steps keeps both v7x TensorCores busy; ~8 balances overhead
MIN_TILE_B = 1024         # >=1024 lanes so DMA per step amortizes ~0.35us step overhead
MAX_TILE_B = 32768        # VMEM-safe on v5e / v6e / v7x (see _vmem_limit_bytes)


def _round_up(n, m):
    return ((n + m - 1) // m) * m


def _pick_tile(batch, tile_b=None, target_steps=TARGET_GRID_STEPS):
    if tile_b is None:
        tb = _round_up(-(-batch // max(target_steps, 1)), 128)
    else:
        tb = _round_up(int(tile_b), 128)
    tb = max(MIN_TILE_B, min(tb, MAX_TILE_B))
    tb = max(128, min(tb, _round_up(batch, 128)))   # never larger than the batch itself
    return tb


def _vmem_limit_bytes(tb):
    # f32, sublane-padded VMEM footprint per TensorCore:
    #   input block  (9, tb) -> 16 sublanes, double-buffered
    #   output block (9, tb) -> 16 sublanes, double-buffered
    #   two hidden temporaries (18, tb) -> 24 sublanes each
    need = (2 * 16 + 2 * 16 + 2 * 24) * tb * 4 + 2 * PARAM_ROWS * PARAM_COLS * 4
    return int(min(max(2 * need, 16 << 20), 56 << 20))   # stays under v7x's 64 MiB physical


def _tttnet_kernel(x_ref, p_ref, o_ref):
    # x_ref: (9, tb) activations (features on sublanes, batch on lanes)
    # p_ref: (128, 32) packed parameter slab (constant index_map -> VMEM-resident)
    # o_ref: (9, tb)
    x = x_ref[...]

    # Slice parameters directly off the ref (static, aligned offsets -> free).
    w1 = p_ref[W1_ROW:W1_ROW + HIDDEN, :BOARD_SIZE]           # (18, 9)
    w2 = p_ref[W2_ROW:W2_ROW + HIDDEN, :HIDDEN]               # (18, 18)
    w3 = p_ref[W3_ROW:W3_ROW + BOARD_SIZE, :HIDDEN]           # (9, 18)
    b1 = p_ref[B1_ROW:B1_ROW + HIDDEN, 0:1]                   # (18, 1)
    b2 = p_ref[B2_ROW:B2_ROW + HIDDEN, 0:1]                   # (18, 1)
    b3 = p_ref[B3_ROW:B3_ROW + BOARD_SIZE, 0:1]               # (9, 1)

    # PyTorch Linear is y = x @ W.T + b with W (out, in); in feature-major (SoA) form
    # that is exactly y_t = W @ x_t + b.
    h = jnp.maximum(jnp.dot(w1, x, preferred_element_type=jnp.float32) + b1, 0.0)
    h = jnp.maximum(jnp.dot(w2, h, preferred_element_type=jnp.float32) + b2, 0.0)
    out = jnp.dot(w3, h, preferred_element_type=jnp.float32) + b3
    o_ref[...] = out.astype(o_ref.dtype)


def tttnet_forward_t(x_t, param_slab, *, tile_b=None, target_steps=TARGET_GRID_STEPS):
    """Fast path. x_t: (9, B) feature-major activations -> (9, B) logits.

    No wrapper-side pad/transpose copies; the kernel streams x_t / writes the output
    directly.  Accepts float32 (default) or bfloat16 activations.
    """
    if x_t.ndim != 2 or x_t.shape[0] != BOARD_SIZE:
        raise ValueError(f"x_t must have shape ({BOARD_SIZE}, B); got {x_t.shape}")
    if not jnp.issubdtype(x_t.dtype, jnp.floating):
        x_t = x_t.astype(jnp.float32)

    batch = x_t.shape[1]
    tb = _pick_tile(batch, tile_b, target_steps)
    grid = pl.cdiv(batch, tb)

    flops = 2 * batch * (BOARD_SIZE * HIDDEN + HIDDEN * HIDDEN + HIDDEN * BOARD_SIZE)
    bytes_accessed = 2 * batch * BOARD_SIZE * x_t.dtype.itemsize + PARAM_ROWS * PARAM_COLS * 4

    return pl.pallas_call(
        _tttnet_kernel,
        out_shape=jax.ShapeDtypeStruct((BOARD_SIZE, batch), x_t.dtype),
        grid=(grid,),
        in_specs=[
            pl.BlockSpec((BOARD_SIZE, tb), lambda i: (0, i)),            # activations
            pl.BlockSpec((PARAM_ROWS, PARAM_COLS), lambda i: (0, 0)),    # params, resident
        ],
        out_specs=pl.BlockSpec((BOARD_SIZE, tb), lambda i: (0, i)),
        compiler_params=pltpu.CompilerParams(
            dimension_semantics=("parallel",),          # batch tiles shard across TCs (v7x)
            vmem_limit_bytes=_vmem_limit_bytes(tb),
        ),
        cost_estimate=pl.CostEstimate(
            flops=flops, transcendentals=0, bytes_accessed=bytes_accessed),
    )(x_t, param_slab)


def tttnet_forward(x, param_slab, **kwargs):
    """Compatibility wrapper matching the PyTorch module contract: (B, 9) -> (B, 9).

    NOTE: this path pays two HBM transposes around the kernel; for throughput, produce
    and consume the feature-major (9, B) layout and call `tttnet_forward_t` directly.
    """
    if x.ndim != 2 or x.shape[1] != BOARD_SIZE:
        raise ValueError(f"x must have shape (B, {BOARD_SIZE}); got {x.shape}")
    return tttnet_forward_t(x.T, param_slab, **kwargs).T


def init_params(key):
    """PyTorch nn.Linear-style init: W (out, in), b (out,), U(-1/sqrt(fan_in), 1/sqrt(fan_in))."""
    ks = jax.random.split(key, 6)

    def lin(kw, kb, fan_in, fan_out):
        bound = 1.0 / jnp.sqrt(fan_in)
        w = jax.random.uniform(kw, (fan_out, fan_in), jnp.float32, -bound, bound)
        b = jax.random.uniform(kb, (fan_out,), jnp.float32, -bound, bound)
        return w, b

    w1, b1 = lin(ks[0], ks[1], BOARD_SIZE, HIDDEN)
    w2, b2 = lin(ks[2], ks[3], HIDDEN, HIDDEN)
    w3, b3 = lin(ks[4], ks[5], HIDDEN, BOARD_SIZE)
    return {"w1": w1, "b1": b1, "w2": w2, "b2": b2, "w3": w3, "b3": b3}


def pack_params(p):
    """Pack the six parameter tensors into one (128, 32) f32 slab (single DMA, aligned slices)."""
    slab = jnp.zeros((PARAM_ROWS, PARAM_COLS), jnp.float32)
    slab = slab.at[W1_ROW:W1_ROW + HIDDEN, :BOARD_SIZE].set(p["w1"])
    slab = slab.at[W2_ROW:W2_ROW + HIDDEN, :HIDDEN].set(p["w2"])
    slab = slab.at[W3_ROW:W3_ROW + BOARD_SIZE, :HIDDEN].set(p["w3"])
    slab = slab.at[B1_ROW:B1_ROW + HIDDEN, 0].set(p["b1"])
    slab = slab.at[B2_ROW:B2_ROW + HIDDEN, 0].set(p["b2"])
    slab = slab.at[B3_ROW:B3_ROW + BOARD_SIZE, 0].set(p["b3"])
    return slab


def reference_forward(x, p):
    h = jnp.maximum(x @ p["w1"].T + p["b1"], 0.0)
    h = jnp.maximum(h @ p["w2"].T + p["b2"], 0.0)
    return h @ p["w3"].T + p["b3"]


if __name__ == "__main__":
    key = jax.random.PRNGKey(0)
    k_param, k_x1, k_x2 = jax.random.split(key, 3)

    params = init_params(k_param)
    slab = pack_params(params)

    # Small batch via the module-native (B, 9) contract: 8 boards with values in {-1, 0, 1}.
    B = 8
    x = jax.random.randint(k_x1, (B, BOARD_SIZE), -1, 2).astype(jnp.float32)
    out = jax.block_until_ready(tttnet_forward(x, slab))
    ref = reference_forward(x, params)
    assert out.shape == (B, BOARD_SIZE)
    assert jnp.allclose(out, ref, atol=1e-5, rtol=1e-5)

    # Larger batch on the fast feature-major path: multiple grid steps + ragged final block.
    B2 = 2000
    x2 = jax.random.randint(k_x2, (B2, BOARD_SIZE), -1, 2).astype(jnp.float32)
    x2_t = x2.T                                   # (9, B2) "SoA" layout, no pad needed
    out2_t = jax.block_until_ready(tttnet_forward_t(x2_t, slab))
    ref2 = reference_forward(x2, params)
    assert out2_t.shape == (BOARD_SIZE, B2)
    assert jnp.allclose(out2_t.T, ref2, atol=1e-5, rtol=1e-5)

    print("KERNEL_OK")
</pallas_src>

<mosaic_0001>
module attributes {stable_mosaic.version = 11 : i64} {
  func.func @_tttnet_kernel(%arg0: i32, %arg1: memref<9x128xf32, #tpu.memory_space<vmem>>, %arg2: memref<128x32xf32, #tpu.memory_space<vmem>>, %arg3: memref<9x128xf32, #tpu.memory_space<vmem>>) attributes {dimension_semantics = [#tpu.dimension_semantics<parallel>], iteration_bounds = array<i64: 1>, scalar_prefetch = 0 : i64, scratch_operands = 0 : i64, tpu.core_type = #tpu.core_type<tc>, window_params = [{transform_indices = @transform_0, window_bounds = array<i64: 9, 128>}, {pipeline_mode = #tpu.pipeline_mode<synchronous>, transform_indices = @transform_1, window_bounds = array<i64: 128, 32>}, {transform_indices = @transform_2, window_bounds = array<i64: 9, 128>}]} {
    %c0 = arith.constant 0 : index
    %c0_0 = arith.constant 0 : index
    %0 = vector.load %arg1[%c0, %c0_0] : memref<9x128xf32, #tpu.memory_space<vmem>>, vector<9x128xf32>
    %c0_1 = arith.constant 0 : index
    %c0_2 = arith.constant 0 : index
    %1 = vector.load %arg2[%c0_1, %c0_2] : memref<128x32xf32, #tpu.memory_space<vmem>>, vector<18x9xf32>
    %c24 = arith.constant 24 : index
    %c0_3 = arith.constant 0 : index
    %2 = vector.load %arg2[%c24, %c0_3] : memref<128x32xf32, #tpu.memory_space<vmem>>, vector<18x18xf32>
    %c48 = arith.constant 48 : index
    %c0_4 = arith.constant 0 : index
    %3 = vector.load %arg2[%c48, %c0_4] : memref<128x32xf32, #tpu.memory_space<vmem>>, vector<9x18xf32>
    %c64 = arith.constant 64 : index
    %c0_5 = arith.constant 0 : index
    %4 = vector.load %arg2[%c64, %c0_5] : memref<128x32xf32, #tpu.memory_space<vmem>>, vector<18x1xf32>
    %c88 = arith.constant 88 : index
    %c0_6 = arith.constant 0 : index
    %5 = vector.load %arg2[%c88, %c0_6] : memref<128x32xf32, #tpu.memory_space<vmem>>, vector<18x1xf32>
    %c112 = arith.constant 112 : index
    %c0_7 = arith.constant 0 : index
    %6 = vector.load %arg2[%c112, %c0_7] : memref<128x32xf32, #tpu.memory_space<vmem>>, vector<9x1xf32>
    %cst = arith.constant dense<0.000000e+00> : vector<18x128xf32>
    %7 = tpu.matmul %1, %0, %cst {dimension_numbers = #tpu.dot_dimension_numbers<[1], [0], [0], [1], [0, 0, 1, 1], [], []>} : vector<18x9xf32>, vector<9x128xf32>, vector<18x128xf32> -> vector<18x128xf32>
    %8 = vector.broadcast %4 : vector<18x1xf32> to vector<18x128xf32>
    %9 = arith.addf %7, %8 : vector<18x128xf32>
    %cst_8 = arith.constant 0.000000e+00 : f32
    %10 = vector.broadcast %cst_8 : f32 to vector<18x128xf32>
    %11 = arith.maximumf %9, %10 : vector<18x128xf32>
    %cst_9 = arith.constant dense<0.000000e+00> : vector<18x128xf32>
    %12 = tpu.matmul %2, %11, %cst_9 {dimension_numbers = #tpu.dot_dimension_numbers<[1], [0], [0], [1], [0, 0, 1, 1], [], []>} : vector<18x18xf32>, vector<18x128xf32>, vector<18x128xf32> -> vector<18x128xf32>
    %13 = vector.broadcast %5 : vector<18x1xf32> to vector<18x128xf32>
    %14 = arith.addf %12, %13 : vector<18x128xf32>
    %cst_10 = arith.constant 0.000000e+00 : f32
    %15 = vector.broadcast %cst_10 : f32 to vector<18x128xf32>
    %16 = arith.maximumf %14, %15 : vector<18x128xf32>
    %cst_11 = arith.constant dense<0.000000e+00> : vector<9x128xf32>
    %17 = tpu.matmul %3, %16, %cst_11 {dimension_numbers = #tpu.dot_dimension_numbers<[1], [0], [0], [1], [0, 0, 1, 1], [], []>} : vector<9x18xf32>, vector<18x128xf32>, vector<9x128xf32> -> vector<9x128xf32>
    %18 = vector.broadcast %6 : vector<9x1xf32> to vector<9x128xf32>
    %19 = arith.addf %17, %18 : vector<9x128xf32>
    %c0_12 = arith.constant 0 : index
    %c0_13 = arith.constant 0 : index
    %20 = vector.load %arg3[%c0_12, %c0_13] : memref<9x128xf32, #tpu.memory_space<vmem>>, vector<9x128xf32>
    tpu.vector_store %arg3[%c0_12, %c0_13], %19 {strides = array<i32>} : memref<9x128xf32, #tpu.memory_space<vmem>>, vector<9x128xf32>,
    return
  }
  func.func @transform_0(%arg0: i32) -> (i32, i32) {
    %c0_i32 = arith.constant 0 : i32
    %c0_i32_0 = arith.constant 0 : i32
    return %c0_i32, %arg0 : i32, i32
  }
  func.func @transform_1(%arg0: i32) -> (i32, i32) {
    %c0_i32 = arith.constant 0 : i32
    %c0_i32_0 = arith.constant 0 : i32
    %c0_i32_1 = arith.constant 0 : i32
    return %c0_i32, %c0_i32_0 : i32, i32
  }
  func.func @transform_2(%arg0: i32) -> (i32, i32) {
    %c0_i32 = arith.constant 0 : i32
    %c0_i32_0 = arith.constant 0 : i32
    return %c0_i32, %arg0 : i32, i32
  }
}

</mosaic_0001>

<bundles_post_ra>
// kernel: tpu_custom_call.1
= control target key start
LH: loop header
LB: loop body
LE: loop exit
PB: predicated region body
PF: predicated region fallthrough
CT: control target
= control target key end

     0   :  { %vm54_vm0 = vcmask 1040384   ;;  %v435_v0 = vmov 0.0|0.0   ;;  %vm436_vm1 = vmmov 1   ;;  %vm437_vm3 = vmmov 0   ;;  %s532_s0 = inlined_call_operand.vmem [shape: f32[9,8], index: 0, kind: input, shape index: {}]   ;;  %s533_s1 = inlined_call_operand.vmem [shape: f32[128,32], index: 1, kind: input, shape index: {}]   ;;  %s534_s2 = inlined_call_operand.vmem [shape: f32[9,8], index: 2, kind: output, shape index: {}]  }
   0x1   :  { %417 = vmatprep.subr.bf16.mxu0 %v435_v0  ;;  %v11_v1 = vld [vmem:[%s532_s0] sm:$0xff]  ;;  %v12_v2 = vld [vmem:[%s532_s0 + $0x8] sm:$0x1]  ;;  %vm419_vm2 = vmpackc.low %vm54_vm0, %vm436_vm1  ;;  %421 = vmatprep.subr.bf16.mxu1 %v435_v0  ;;  %v438_v4 = vmov 0.0   ;;  %v439_v5 = vmov 0   ;;  %vm44_vm4 = vcmask 72704  }
   0x2   :  { %v418_v3 = vpack.c.bf16 %v12_v2, %v11_v1  ;;  %384 = vmatprep.mubr.msk.f32.mxu0 %vm437_vm3, %v438_v4  ;;  %433 = vset.pattern.permute.xlu0 %v439_v5  ;;  %v21_v6 = vld [vmem:[%s533_s1 + $0x40] sm:$0xff]  ;;  %v23_v8 = vld [vmem:[%s533_s1 + $0x50] sm:$0x3]  ;;  %v22_v9 = vld [vmem:[%s533_s1 + $0x48] sm:$0xff]  ;;  %vm166_vm5 = vcmask 1041408   ;;  %vm156_vm6 = vcmask 146432  }
   0x3   :  { %434 = vset.pattern.permute.xlu1 %v439_v5  ;;  %399 = vmatprep.mubr.msk.f32.mxu1 %vm437_vm3, %v438_v4  ;;  %v13_v7 = vld [vmem:[%s533_s1] sm:$0xff]  ;;  %v24_v10 = vld [vmem:[%s533_s1 + $0x58] sm:$0xff]  ;;  %v14_v11 = vld [vmem:[%s533_s1 + $0x8] sm:$0xff] }
   0x4   :  { %420 = vmatpush3.bf16.msk.msra.mxu0 %vm419_vm2, %v418_v3  ;;  %31 = vperm.xlu0 %433, %v21_v6   ;;  %v25_v12 = vld [vmem:[%s533_s1 + $0x60] sm:$0xff]  ;;  %v26_v13 = vld [vmem:[%s533_s1 + $0x68] sm:$0x3]  ;;  %v15_v14 = vld [vmem:[%s533_s1 + $0x10] sm:$0x3] }
   0x5   :  { %41 = vperm.xlu1 %434, %v23_v8   ;;  %v27_v15 = vld [vmem:[%s533_s1 + $0x70] sm:$0xff]  ;;  %v28_v16 = vld [vmem:[%s533_s1 + $0x78] sm:$0x1]  ;;  %v17_v34 = vld [vmem:[%s533_s1 + $0x20] sm:$0xff] }
   0x6   :  { %v16_v33 = vld [vmem:[%s533_s1 + $0x18] sm:$0xff]  ;;  %v18_v35 = vld [vmem:[%s533_s1 + $0x28] sm:$0x3]  ;;  %v19_v36 = vld [vmem:[%s533_s1 + $0x30] sm:$0xff] }
   0x7   :  { %385 = vmatmul.mubr.msk.f32.vlgmr.msra.gmra.mrb[0].mxu0 %vm44_vm4, %v13_v7  ;;  %v20_v53 = vld [vmem:[%s533_s1 + $0x38] sm:$0x1] }
   0x8   :  { %387 = vmatprep.mubr.msk.f32.mxu0 %vm437_vm3, %v438_v4  ;;  %36 = vperm.xlu0 %433, %v22_v9  }
   0x9   :  { %143 = vperm.xlu1 %434, %v24_v10  }
   0xb   :  { %388 = vmatmul.mubr.msk.f32.gmra.mrb[2].mxu0 %vm44_vm4, %v14_v11 }
   0xc   :  { %390 = vmatprep.mubr.msk.f32.mxu0 %vm437_vm3, %v438_v4  ;;  %148 = vperm.xlu0 %433, %v25_v12  }
   0xd   :  { %153 = vperm.xlu1 %434, %v26_v13  }
   0xf   :  { %391 = vmatmul.mubr.msk.f32.gmra.mrb[4].mxu0 %vm44_vm4, %v15_v14 }
  0x10   :  { %255 = vperm.xlu0 %433, %v27_v15   ;;  %414 = vmatprep.mubr.msk.f32.mxu0 %vm156_vm6, %v19_v36 }
  0x11   :  { %260 = vperm.xlu1 %434, %v28_v16  }
  0x83   :  { %v32_v17 = vpop.permute.xlu0 %31 }
  0x84   :  { %v42_v27 = vpop.permute.xlu1 %41 }
  0x87   :  { %v37_v21 = vpop.permute.xlu0 %36 }
  0x88   :  { %v144_v39 = vpop.permute.xlu1 %143 }
  0x8b   :  { %v149_v41 = vpop.permute.xlu0 %148 }
  0x8c   :  { %v154_v47 = vpop.permute.xlu1 %153 }
  0x8f   :  { %v256_v56 = vpop.permute.xlu0 %255 }
  0x90   :  { %v261_v54 = vpop.permute.xlu1 %260 }
  0xda   :  { %v124_v18 = vpop.f32.mrb[0].mxu0 }
  0xdb   :  { %v386_v19 = vpop.f32.mrb[1].mxu0  ;;  %v125_v20 = vadd.f32 %v124_v18, %v32_v17 }
  0xdd   :  { %v138_v25 = vmax.f32 %v125_v20, 0.0 }
  0xde   :  { %v129_v22 = vpop.f32.mrb[2].mxu0 }
  0xdf   :  { %v130_v23 = vadd.f32 %v129_v22, %v37_v21  ;;  %v389_v24 = vpop.f32.mrb[3].mxu0 }
  0xe1   :  { %v139_v26 = vmax.f32 %v130_v23, 0.0 }
  0xe2   :  { %v134_v28 = vpop.f32.mrb[4].mxu0 }
  0xe3   :  { %v135_v29 = vadd.f32 %v134_v28, %v42_v27  ;;  %v392_v30 = vpop.f32.mrb[5].mxu0  ;;  %v422_v31 = vpack.c.bf16 %v139_v26, %v138_v25 }
  0xe5   :  { %v140_v32 = vmax.f32 %v135_v29, 0.0  ;;  %423 = vmatpush3.bf16.msra.mxu1 %v422_v31 }
  0xe6   :  { %397 = vmatprep.subr.mxu1 %v438_v4 }
  0xe9   :  { %398 = vmatpush3.msk.msra.mxu1 %vm166_vm5, %v140_v32 }
  0xea   :  { %400 = vmatmul.mubr.msk.f32.vlgmr.msra.gmra.mrb[0].mxu1 %vm156_vm6, %v16_v33 }
  0xeb   :  { %402 = vmatprep.mubr.msk.f32.mxu1 %vm437_vm3, %v438_v4 }
  0xee   :  { %403 = vmatmul.mubr.msk.f32.gmra.mrb[2].mxu1 %vm156_vm6, %v17_v34 }
  0xef   :  { %405 = vmatprep.mubr.msk.f32.mxu1 %vm437_vm3, %v438_v4 }
  0xf2   :  { %406 = vmatmul.mubr.msk.f32.gmra.mrb[4].mxu1 %vm156_vm6, %v18_v35 }
 0x1bd   :  { %v236_v37 = vpop.f32.mrb[0].mxu1 }
 0x1be   :  { %v401_v38 = vpop.f32.mrb[1].mxu1  ;;  %v237_v40 = vadd.f32 %v236_v37, %v144_v39 }
 0x1c0   :  { %v250_v45 = vmax.f32 %v237_v40, 0.0 }
 0x1c1   :  { %v241_v42 = vpop.f32.mrb[2].mxu1 }
 0x1c2   :  { %v242_v43 = vadd.f32 %v241_v42, %v149_v41  ;;  %v404_v44 = vpop.f32.mrb[3].mxu1 }
 0x1c4   :  { %v251_v46 = vmax.f32 %v242_v43, 0.0 }
 0x1c5   :  { %v246_v48 = vpop.f32.mrb[4].mxu1 }
 0x1c6   :  { %v424_v49 = vpack.c.bf16 %v251_v46, %v250_v45  ;;  %v247_v50 = vadd.f32 %v246_v48, %v154_v47  ;;  %v407_v51 = vpop.f32.mrb[5].mxu1 }
 0x1c8   :  { %v252_v52 = vmax.f32 %v247_v50, 0.0  ;;  %425 = vmatprep.subr.bf16.mxu0 %v424_v49 }
 0x1c9   :  { %427 = vmatpush3.bf16.msra.mxu0 %v424_v49 }
 0x1ca   :  { %412 = vmatprep.subr.msk.mxu0 %vm166_vm5, %v252_v52 }
 0x1cd   :  { %413 = vmatpush3.msk.msra.mxu0 %vm166_vm5, %v252_v52 }
 0x1ce   :  { %415 = vmatmul.mubr.msk.f32.vlgmr.msra.gmra.mrb[6].mxu0 %vm156_vm6, %v20_v53 }
 0x2a1   :  { %v416_v55 = vpop.f32.mrb[6].mxu0 }
 0x2a2   :  { %v344_v57 = vadd.f32 %v416_v55, %v261_v54  ;;  %v338_v58 = vpop.f32.mrb[7].mxu0 }
 0x2a3   :  { %v339_v59 = vadd.f32 %v338_v58, %v256_v56 }
 0x2a4   :  { %348 = vst [vmem:[%s534_s2 + $0x8] sm:$0x1] %v344_v57 }
 0x2a5   :  { %347 = vst [vmem:[%s534_s2] sm:$0xff] %v339_v59 }

</bundles_post_ra>
